<compile_context>
chip_gen: v7x
topology: tpu7x:2x2x1
jax: 0.10.0
libtpu: 0.0.40
codegen_flags: <defaults>
</compile_context>

<pallas_src>
import jax
import jax.numpy as jnp
from jax import lax
from jax.experimental import pallas as pl
from jax.experimental.pallas import tpu as pltpu


def gru_embed_fc_mean_kernel(tok_ref,    # (S*B, 1) int32
                             emb_ref,    # (V, E)
                             wih_ref,    # (E, 3H)
                             whh_ref,    # (H, 3H)
                             bgru_ref,   # (2, 3H)  row0 = b_ih, row1 = b_hh
                             wfc_ref,    # (H, O)
                             bfc_ref,    # (1, O)
                             out_ref):   # (S, O)
    S, _ = out_ref.shape
    SB = tok_ref.shape[0]
    B = SB // S
    V, _ = emb_ref.shape
    H = whh_ref.shape[0]
    H2 = 2 * H

    # ---- fused embedding gather: one-hot (SB,V) @ (V,E) on the MXU --------
    tok = tok_ref[...]                                          # (SB, 1) int32
    vocab_iota = lax.broadcasted_iota(jnp.int32, (SB, V), 1)
    onehot = (vocab_iota == tok).astype(jnp.float32)            # (SB, V)
    x2d = jnp.dot(onehot, emb_ref[...],
                  preferred_element_type=jnp.float32)           # (SB, E)

    # ---- per-gate bias split + b_ih/b_hh fold, once, in-kernel ------------
    bih = bgru_ref[0:1, :]                                      # (1, 3H)
    bhh = bgru_ref[1:2, :]                                      # (1, 3H)
    b_rz = bih[:, :H2] + bhh[:, :H2]                            # (1, 2H)
    bih_n = bih[:, H2:]                                         # (1, H)
    bhh_n = jnp.broadcast_to(bhh[:, H2:], (B, H))               # hoisted bcast

    # ---- hoisted input projection: single (SB,E)@(E,3H) MXU matmul --------
    gx = jnp.dot(x2d, wih_ref[...], preferred_element_type=jnp.float32)
    gx_rz = gx[:, :H2] + b_rz                                   # (SB, 2H)
    gx_n = gx[:, H2:] + bih_n                                   # (SB, H)

    whh = whh_ref[...]                                          # (H, 3H)

    # ---- recurrence: one (B,H)@(H,3H) MXU call per step, static unroll ----
    h = jnp.zeros((B, H), jnp.float32)
    hs = []
    for t in range(S):                      # fixed, small trip count
        lo = t * B                          # sublane-aligned (B % 8 == 0)
        gh = jnp.dot(h, whh, preferred_element_type=jnp.float32)   # (B, 3H)
        rz = jax.nn.sigmoid(gx_rz[lo:lo + B, :] + gh[:, :H2])      # (B, 2H)
        r = rz[:, :H]
        z = rz[:, H:]
        n = jnp.tanh(gx_n[lo:lo + B, :] + r * (gh[:, H2:] + bhh_n))
        h = (1.0 - z) * n + z * h
        hs.append(h)

    # ---- batch-mean + FC (commuted: Linear is affine), single store -------
    hseq = jnp.concatenate(hs, axis=0).reshape(S, B, H)         # (S, B, H)
    hbar = jnp.mean(hseq, axis=1)                               # (S, H)
    y = jnp.dot(hbar, wfc_ref[...],
                preferred_element_type=jnp.float32) + bfc_ref[...]
    out_ref[...] = y


def gru_embedding_forward(tokens, params):
    """tokens: (S, B) int32, seq-first (nn.GRU default). Returns (S, O) f32."""
    S, B = tokens.shape
    assert B % 8 == 0, "batch must be a multiple of 8 (sublane alignment)"
    O = params["w_fc"].shape[1]

    tok2d = tokens.reshape(S * B, 1).astype(jnp.int32)
    b_gru = jnp.concatenate([params["b_ih"], params["b_hh"]], axis=0)  # (2,3H)

    vmem = pl.BlockSpec(memory_space=pltpu.MemorySpace.VMEM)
    out = pl.pallas_call(
        gru_embed_fc_mean_kernel,
        out_shape=jax.ShapeDtypeStruct((S, O), jnp.float32),
        in_specs=[vmem] * 7,
        out_specs=vmem,
    )(tok2d, params["embedding"], params["w_ih"], params["w_hh"], b_gru,
      params["w_fc"], params["b_fc"])
    return out


def reference_forward(tokens, params):
    """Pure-JAX reference mirroring the PyTorch module exactly."""
    emb = params["embedding"]
    x = emb[tokens]                                      # (S, B, E)
    S, B, _ = x.shape
    H = params["w_hh"].shape[0]
    wih, whh = params["w_ih"], params["w_hh"]
    bih, bhh = params["b_ih"], params["b_hh"]

    def step(h, x_t):
        gx = x_t @ wih + bih
        gh = h @ whh + bhh
        r = jax.nn.sigmoid(gx[:, :H] + gh[:, :H])
        z = jax.nn.sigmoid(gx[:, H:2 * H] + gh[:, H:2 * H])
        n = jnp.tanh(gx[:, 2 * H:] + r * gh[:, 2 * H:])
        h_new = (1.0 - z) * n + z * h
        return h_new, h_new

    h0 = jnp.zeros((B, H), jnp.float32)
    _, outputs = lax.scan(step, h0, x)                   # (S, B, H)
    y = outputs @ params["w_fc"] + params["b_fc"]        # (S, B, O)
    return jnp.mean(y, axis=1)                           # (S, O)


def init_params(key, vocab_size, embedding_dim, hidden_dim, output_dim):
    ks = jax.random.split(key, 8)
    k = 1.0 / jnp.sqrt(hidden_dim)
    u = lambda kk, shape, bound: jax.random.uniform(
        kk, shape, jnp.float32, -bound, bound)
    return {
        # nn.Embedding: N(0, 1)
        "embedding": jax.random.normal(ks[0], (vocab_size, embedding_dim),
                                       jnp.float32),
        # nn.GRU weights, stored transposed, gate order [r, z, n]
        "w_ih": u(ks[1], (embedding_dim, 3 * hidden_dim), k),
        "w_hh": u(ks[2], (hidden_dim, 3 * hidden_dim), k),
        "b_ih": u(ks[3], (1, 3 * hidden_dim), k),
        "b_hh": u(ks[4], (1, 3 * hidden_dim), k),
        # nn.Linear, stored transposed
        "w_fc": u(ks[5], (hidden_dim, output_dim),
                  1.0 / jnp.sqrt(hidden_dim)),
        "b_fc": u(ks[6], (1, output_dim), 1.0 / jnp.sqrt(hidden_dim)),
    }


if __name__ == "__main__":
    vocab_size, embedding_dim, hidden_dim, output_dim = 64, 32, 32, 16
    S, B = 8, 8  # (seq_len, batch) -- nn.GRU default seq-first layout

    key = jax.random.PRNGKey(0)
    k_tok, k_par = jax.random.split(key)
    params = init_params(k_par, vocab_size, embedding_dim, hidden_dim,
                         output_dim)
    tokens = jax.random.randint(k_tok, (S, B), 0, vocab_size, jnp.int32)

    out = gru_embedding_forward(tokens, params)
    out = jax.block_until_ready(out)

    ref = jax.block_until_ready(reference_forward(tokens, params))
    assert out.shape == (S, output_dim)
    assert jnp.allclose(out, ref, atol=1e-4, rtol=1e-4), (
        float(jnp.max(jnp.abs(out - ref))))
    print("KERNEL_OK")
</pallas_src>

<mosaic_0001>
module attributes {stable_mosaic.version = 11 : i64} {
  func.func @gru_embed_fc_mean_kernel(%arg0: memref<64x1xi32, #tpu.memory_space<vmem>>, %arg1: memref<64x32xf32, #tpu.memory_space<vmem>>, %arg2: memref<32x96xf32, #tpu.memory_space<vmem>>, %arg3: memref<32x96xf32, #tpu.memory_space<vmem>>, %arg4: memref<2x96xf32, #tpu.memory_space<vmem>>, %arg5: memref<32x16xf32, #tpu.memory_space<vmem>>, %arg6: memref<1x16xf32, #tpu.memory_space<vmem>>, %arg7: memref<8x16xf32, #tpu.memory_space<vmem>>) attributes {dimension_semantics = [], scalar_prefetch = 0 : i64, scratch_operands = 0 : i64, tpu.core_type = #tpu.core_type<tc>} {
    %c0 = arith.constant 0 : index
    %c0_0 = arith.constant 0 : index
    %0 = vector.load %arg0[%c0, %c0_0] : memref<64x1xi32, #tpu.memory_space<vmem>>, vector<64x1xi32>
    %1 = tpu.iota {dimensions = array<i32: 1>} : vector<64x64xi32>
    %2 = vector.broadcast %0 : vector<64x1xi32> to vector<64x64xi32>
    %3 = arith.cmpi eq, %1, %2 : vector<64x64xi32>
    %4 = arith.extui %3 : vector<64x64xi1> to vector<64x64xi32>
    %5 = arith.sitofp %4 : vector<64x64xi32> to vector<64x64xf32>
    %c0_1 = arith.constant 0 : index
    %c0_2 = arith.constant 0 : index
    %6 = vector.load %arg1[%c0_1, %c0_2] : memref<64x32xf32, #tpu.memory_space<vmem>>, vector<64x32xf32>
    %cst = arith.constant dense<0.000000e+00> : vector<64x32xf32>
    %7 = tpu.matmul %5, %6, %cst {dimension_numbers = #tpu.dot_dimension_numbers<[1], [0], [0], [1], [0, 0, 1, 1], [], []>} : vector<64x64xf32>, vector<64x32xf32>, vector<64x32xf32> -> vector<64x32xf32>
    %c0_3 = arith.constant 0 : index
    %c0_4 = arith.constant 0 : index
    %8 = vector.load %arg4[%c0_3, %c0_4] : memref<2x96xf32, #tpu.memory_space<vmem>>, vector<1x96xf32>
    %c1 = arith.constant 1 : index
    %c0_5 = arith.constant 0 : index
    %9 = vector.load %arg4[%c1, %c0_5] : memref<2x96xf32, #tpu.memory_space<vmem>>, vector<1x96xf32>
    %10 = vector.extract_strided_slice %8 {offsets = [0, 0], sizes = [1, 64], strides = [1, 1]} : vector<1x96xf32> to vector<1x64xf32>
    %11 = vector.extract_strided_slice %9 {offsets = [0, 0], sizes = [1, 64], strides = [1, 1]} : vector<1x96xf32> to vector<1x64xf32>
    %12 = arith.addf %10, %11 : vector<1x64xf32>
    %13 = vector.extract_strided_slice %8 {offsets = [0, 64], sizes = [1, 32], strides = [1, 1]} : vector<1x96xf32> to vector<1x32xf32>
    %14 = vector.extract_strided_slice %9 {offsets = [0, 64], sizes = [1, 32], strides = [1, 1]} : vector<1x96xf32> to vector<1x32xf32>
    %15 = vector.shape_cast %14 : vector<1x32xf32> to vector<1x32xf32>
    %16 = vector.broadcast %15 : vector<1x32xf32> to vector<8x32xf32>
    %c0_6 = arith.constant 0 : index
    %c0_7 = arith.constant 0 : index
    %17 = vector.load %arg2[%c0_6, %c0_7] : memref<32x96xf32, #tpu.memory_space<vmem>>, vector<32x96xf32>
    %cst_8 = arith.constant dense<0.000000e+00> : vector<64x96xf32>
    %18 = tpu.matmul %7, %17, %cst_8 {dimension_numbers = #tpu.dot_dimension_numbers<[1], [0], [0], [1], [0, 0, 1, 1], [], []>} : vector<64x32xf32>, vector<32x96xf32>, vector<64x96xf32> -> vector<64x96xf32>
    %19 = vector.extract_strided_slice %18 {offsets = [0, 0], sizes = [64, 64], strides = [1, 1]} : vector<64x96xf32> to vector<64x64xf32>
    %20 = vector.broadcast %12 : vector<1x64xf32> to vector<64x64xf32>
    %21 = arith.addf %19, %20 : vector<64x64xf32>
    %22 = vector.extract_strided_slice %18 {offsets = [0, 64], sizes = [64, 32], strides = [1, 1]} : vector<64x96xf32> to vector<64x32xf32>
    %23 = vector.broadcast %13 : vector<1x32xf32> to vector<64x32xf32>
    %24 = arith.addf %22, %23 : vector<64x32xf32>
    %c0_9 = arith.constant 0 : index
    %c0_10 = arith.constant 0 : index
    %25 = vector.load %arg3[%c0_9, %c0_10] : memref<32x96xf32, #tpu.memory_space<vmem>>, vector<32x96xf32>
    %cst_11 = arith.constant 0.000000e+00 : f32
    %26 = vector.broadcast %cst_11 : f32 to vector<8x32xf32>
    %cst_12 = arith.constant dense<0.000000e+00> : vector<8x96xf32>
    %27 = tpu.matmul %26, %25, %cst_12 {dimension_numbers = #tpu.dot_dimension_numbers<[1], [0], [0], [1], [0, 0, 1, 1], [], []>} : vector<8x32xf32>, vector<32x96xf32>, vector<8x96xf32> -> vector<8x96xf32>
    %28 = vector.extract_strided_slice %21 {offsets = [0, 0], sizes = [8, 64], strides = [1, 1]} : vector<64x64xf32> to vector<8x64xf32>
    %29 = vector.extract_strided_slice %27 {offsets = [0, 0], sizes = [8, 64], strides = [1, 1]} : vector<8x96xf32> to vector<8x64xf32>
    %30 = arith.addf %28, %29 : vector<8x64xf32>
    %31 = arith.negf %30 : vector<8x64xf32>
    %32 = math.exp %31 : vector<8x64xf32>
    %cst_13 = arith.constant 1.000000e+00 : f32
    %33 = vector.broadcast %cst_13 : f32 to vector<8x64xf32>
    %34 = arith.addf %33, %32 : vector<8x64xf32>
    %35 = arith.divf %33, %34 : vector<8x64xf32>
    %36 = vector.extract_strided_slice %35 {offsets = [0, 0], sizes = [8, 32], strides = [1, 1]} : vector<8x64xf32> to vector<8x32xf32>
    %37 = vector.extract_strided_slice %35 {offsets = [0, 32], sizes = [8, 32], strides = [1, 1]} : vector<8x64xf32> to vector<8x32xf32>
    %38 = vector.extract_strided_slice %24 {offsets = [0, 0], sizes = [8, 32], strides = [1, 1]} : vector<64x32xf32> to vector<8x32xf32>
    %39 = vector.extract_strided_slice %27 {offsets = [0, 64], sizes = [8, 32], strides = [1, 1]} : vector<8x96xf32> to vector<8x32xf32>
    %40 = arith.addf %39, %16 : vector<8x32xf32>
    %41 = arith.mulf %36, %40 : vector<8x32xf32>
    %42 = arith.addf %38, %41 : vector<8x32xf32>
    %43 = math.tanh %42 : vector<8x32xf32>
    %cst_14 = arith.constant 1.000000e+00 : f32
    %44 = vector.broadcast %cst_14 : f32 to vector<8x32xf32>
    %45 = arith.subf %44, %37 : vector<8x32xf32>
    %46 = arith.mulf %45, %43 : vector<8x32xf32>
    %47 = arith.mulf %37, %26 : vector<8x32xf32>
    %48 = arith.addf %46, %47 : vector<8x32xf32>
    %cst_15 = arith.constant dense<0.000000e+00> : vector<8x96xf32>
    %49 = tpu.matmul %48, %25, %cst_15 {dimension_numbers = #tpu.dot_dimension_numbers<[1], [0], [0], [1], [0, 0, 1, 1], [], []>} : vector<8x32xf32>, vector<32x96xf32>, vector<8x96xf32> -> vector<8x96xf32>
    %50 = vector.extract_strided_slice %21 {offsets = [8, 0], sizes = [8, 64], strides = [1, 1]} : vector<64x64xf32> to vector<8x64xf32>
    %51 = vector.extract_strided_slice %49 {offsets = [0, 0], sizes = [8, 64], strides = [1, 1]} : vector<8x96xf32> to vector<8x64xf32>
    %52 = arith.addf %50, %51 : vector<8x64xf32>
    %53 = arith.negf %52 : vector<8x64xf32>
    %54 = math.exp %53 : vector<8x64xf32>
    %cst_16 = arith.constant 1.000000e+00 : f32
    %55 = vector.broadcast %cst_16 : f32 to vector<8x64xf32>
    %56 = arith.addf %55, %54 : vector<8x64xf32>
    %57 = arith.divf %55, %56 : vector<8x64xf32>
    %58 = vector.extract_strided_slice %57 {offsets = [0, 0], sizes = [8, 32], strides = [1, 1]} : vector<8x64xf32> to vector<8x32xf32>
    %59 = vector.extract_strided_slice %57 {offsets = [0, 32], sizes = [8, 32], strides = [1, 1]} : vector<8x64xf32> to vector<8x32xf32>
    %60 = vector.extract_strided_slice %24 {offsets = [8, 0], sizes = [8, 32], strides = [1, 1]} : vector<64x32xf32> to vector<8x32xf32>
    %61 = vector.extract_strided_slice %49 {offsets = [0, 64], sizes = [8, 32], strides = [1, 1]} : vector<8x96xf32> to vector<8x32xf32>
    %62 = arith.addf %61, %16 : vector<8x32xf32>
    %63 = arith.mulf %58, %62 : vector<8x32xf32>
    %64 = arith.addf %60, %63 : vector<8x32xf32>
    %65 = math.tanh %64 : vector<8x32xf32>
    %cst_17 = arith.constant 1.000000e+00 : f32
    %66 = vector.broadcast %cst_17 : f32 to vector<8x32xf32>
    %67 = arith.subf %66, %59 : vector<8x32xf32>
    %68 = arith.mulf %67, %65 : vector<8x32xf32>
    %69 = arith.mulf %59, %48 : vector<8x32xf32>
    %70 = arith.addf %68, %69 : vector<8x32xf32>
    %cst_18 = arith.constant dense<0.000000e+00> : vector<8x96xf32>
    %71 = tpu.matmul %70, %25, %cst_18 {dimension_numbers = #tpu.dot_dimension_numbers<[1], [0], [0], [1], [0, 0, 1, 1], [], []>} : vector<8x32xf32>, vector<32x96xf32>, vector<8x96xf32> -> vector<8x96xf32>
    %72 = vector.extract_strided_slice %21 {offsets = [16, 0], sizes = [8, 64], strides = [1, 1]} : vector<64x64xf32> to vector<8x64xf32>
    %73 = vector.extract_strided_slice %71 {offsets = [0, 0], sizes = [8, 64], strides = [1, 1]} : vector<8x96xf32> to vector<8x64xf32>
    %74 = arith.addf %72, %73 : vector<8x64xf32>
    %75 = arith.negf %74 : vector<8x64xf32>
    %76 = math.exp %75 : vector<8x64xf32>
    %cst_19 = arith.constant 1.000000e+00 : f32
    %77 = vector.broadcast %cst_19 : f32 to vector<8x64xf32>
    %78 = arith.addf %77, %76 : vector<8x64xf32>
    %79 = arith.divf %77, %78 : vector<8x64xf32>
    %80 = vector.extract_strided_slice %79 {offsets = [0, 0], sizes = [8, 32], strides = [1, 1]} : vector<8x64xf32> to vector<8x32xf32>
    %81 = vector.extract_strided_slice %79 {offsets = [0, 32], sizes = [8, 32], strides = [1, 1]} : vector<8x64xf32> to vector<8x32xf32>
    %82 = vector.extract_strided_slice %24 {offsets = [16, 0], sizes = [8, 32], strides = [1, 1]} : vector<64x32xf32> to vector<8x32xf32>
    %83 = vector.extract_strided_slice %71 {offsets = [0, 64], sizes = [8, 32], strides = [1, 1]} : vector<8x96xf32> to vector<8x32xf32>
    %84 = arith.addf %83, %16 : vector<8x32xf32>
    %85 = arith.mulf %80, %84 : vector<8x32xf32>
    %86 = arith.addf %82, %85 : vector<8x32xf32>
    %87 = math.tanh %86 : vector<8x32xf32>
    %cst_20 = arith.constant 1.000000e+00 : f32
    %88 = vector.broadcast %cst_20 : f32 to vector<8x32xf32>
    %89 = arith.subf %88, %81 : vector<8x32xf32>
    %90 = arith.mulf %89, %87 : vector<8x32xf32>
    %91 = arith.mulf %81, %70 : vector<8x32xf32>
    %92 = arith.addf %90, %91 : vector<8x32xf32>
    %cst_21 = arith.constant dense<0.000000e+00> : vector<8x96xf32>
    %93 = tpu.matmul %92, %25, %cst_21 {dimension_numbers = #tpu.dot_dimension_numbers<[1], [0], [0], [1], [0, 0, 1, 1], [], []>} : vector<8x32xf32>, vector<32x96xf32>, vector<8x96xf32> -> vector<8x96xf32>
    %94 = vector.extract_strided_slice %21 {offsets = [24, 0], sizes = [8, 64], strides = [1, 1]} : vector<64x64xf32> to vector<8x64xf32>
    %95 = vector.extract_strided_slice %93 {offsets = [0, 0], sizes = [8, 64], strides = [1, 1]} : vector<8x96xf32> to vector<8x64xf32>
    %96 = arith.addf %94, %95 : vector<8x64xf32>
    %97 = arith.negf %96 : vector<8x64xf32>
    %98 = math.exp %97 : vector<8x64xf32>
    %cst_22 = arith.constant 1.000000e+00 : f32
    %99 = vector.broadcast %cst_22 : f32 to vector<8x64xf32>
    %100 = arith.addf %99, %98 : vector<8x64xf32>
    %101 = arith.divf %99, %100 : vector<8x64xf32>
    %102 = vector.extract_strided_slice %101 {offsets = [0, 0], sizes = [8, 32], strides = [1, 1]} : vector<8x64xf32> to vector<8x32xf32>
    %103 = vector.extract_strided_slice %101 {offsets = [0, 32], sizes = [8, 32], strides = [1, 1]} : vector<8x64xf32> to vector<8x32xf32>
    %104 = vector.extract_strided_slice %24 {offsets = [24, 0], sizes = [8, 32], strides = [1, 1]} : vector<64x32xf32> to vector<8x32xf32>
    %105 = vector.extract_strided_slice %93 {offsets = [0, 64], sizes = [8, 32], strides = [1, 1]} : vector<8x96xf32> to vector<8x32xf32>
    %106 = arith.addf %105, %16 : vector<8x32xf32>
    %107 = arith.mulf %102, %106 : vector<8x32xf32>
    %108 = arith.addf %104, %107 : vector<8x32xf32>
    %109 = math.tanh %108 : vector<8x32xf32>
    %cst_23 = arith.constant 1.000000e+00 : f32
    %110 = vector.broadcast %cst_23 : f32 to vector<8x32xf32>
    %111 = arith.subf %110, %103 : vector<8x32xf32>
    %112 = arith.mulf %111, %109 : vector<8x32xf32>
    %113 = arith.mulf %103, %92 : vector<8x32xf32>
    %114 = arith.addf %112, %113 : vector<8x32xf32>
    %cst_24 = arith.constant dense<0.000000e+00> : vector<8x96xf32>
    %115 = tpu.matmul %114, %25, %cst_24 {dimension_numbers = #tpu.dot_dimension_numbers<[1], [0], [0], [1], [0, 0, 1, 1], [], []>} : vector<8x32xf32>, vector<32x96xf32>, vector<8x96xf32> -> vector<8x96xf32>
    %116 = vector.extract_strided_slice %21 {offsets = [32, 0], sizes = [8, 64], strides = [1, 1]} : vector<64x64xf32> to vector<8x64xf32>
    %117 = vector.extract_strided_slice %115 {offsets = [0, 0], sizes = [8, 64], strides = [1, 1]} : vector<8x96xf32> to vector<8x64xf32>
    %118 = arith.addf %116, %117 : vector<8x64xf32>
    %119 = arith.negf %118 : vector<8x64xf32>
    %120 = math.exp %119 : vector<8x64xf32>
    %cst_25 = arith.constant 1.000000e+00 : f32
    %121 = vector.broadcast %cst_25 : f32 to vector<8x64xf32>
    %122 = arith.addf %121, %120 : vector<8x64xf32>
    %123 = arith.divf %121, %122 : vector<8x64xf32>
    %124 = vector.extract_strided_slice %123 {offsets = [0, 0], sizes = [8, 32], strides = [1, 1]} : vector<8x64xf32> to vector<8x32xf32>
    %125 = vector.extract_strided_slice %123 {offsets = [0, 32], sizes = [8, 32], strides = [1, 1]} : vector<8x64xf32> to vector<8x32xf32>
    %126 = vector.extract_strided_slice %24 {offsets = [32, 0], sizes = [8, 32], strides = [1, 1]} : vector<64x32xf32> to vector<8x32xf32>
    %127 = vector.extract_strided_slice %115 {offsets = [0, 64], sizes = [8, 32], strides = [1, 1]} : vector<8x96xf32> to vector<8x32xf32>
    %128 = arith.addf %127, %16 : vector<8x32xf32>
    %129 = arith.mulf %124, %128 : vector<8x32xf32>
    %130 = arith.addf %126, %129 : vector<8x32xf32>
    %131 = math.tanh %130 : vector<8x32xf32>
    %cst_26 = arith.constant 1.000000e+00 : f32
    %132 = vector.broadcast %cst_26 : f32 to vector<8x32xf32>
    %133 = arith.subf %132, %125 : vector<8x32xf32>
    %134 = arith.mulf %133, %131 : vector<8x32xf32>
    %135 = arith.mulf %125, %114 : vector<8x32xf32>
    %136 = arith.addf %134, %135 : vector<8x32xf32>
    %cst_27 = arith.constant dense<0.000000e+00> : vector<8x96xf32>
    %137 = tpu.matmul %136, %25, %cst_27 {dimension_numbers = #tpu.dot_dimension_numbers<[1], [0], [0], [1], [0, 0, 1, 1], [], []>} : vector<8x32xf32>, vector<32x96xf32>, vector<8x96xf32> -> vector<8x96xf32>
    %138 = vector.extract_strided_slice %21 {offsets = [40, 0], sizes = [8, 64], strides = [1, 1]} : vector<64x64xf32> to vector<8x64xf32>
    %139 = vector.extract_strided_slice %137 {offsets = [0, 0], sizes = [8, 64], strides = [1, 1]} : vector<8x96xf32> to vector<8x64xf32>
    %140 = arith.addf %138, %139 : vector<8x64xf32>
    %141 = arith.negf %140 : vector<8x64xf32>
    %142 = math.exp %141 : vector<8x64xf32>
    %cst_28 = arith.constant 1.000000e+00 : f32
    %143 = vector.broadcast %cst_28 : f32 to vector<8x64xf32>
    %144 = arith.addf %143, %142 : vector<8x64xf32>
    %145 = arith.divf %143, %144 : vector<8x64xf32>
    %146 = vector.extract_strided_slice %145 {offsets = [0, 0], sizes = [8, 32], strides = [1, 1]} : vector<8x64xf32> to vector<8x32xf32>
    %147 = vector.extract_strided_slice %145 {offsets = [0, 32], sizes = [8, 32], strides = [1, 1]} : vector<8x64xf32> to vector<8x32xf32>
    %148 = vector.extract_strided_slice %24 {offsets = [40, 0], sizes = [8, 32], strides = [1, 1]} : vector<64x32xf32> to vector<8x32xf32>
    %149 = vector.extract_strided_slice %137 {offsets = [0, 64], sizes = [8, 32], strides = [1, 1]} : vector<8x96xf32> to vector<8x32xf32>
    %150 = arith.addf %149, %16 : vector<8x32xf32>
    %151 = arith.mulf %146, %150 : vector<8x32xf32>
    %152 = arith.addf %148, %151 : vector<8x32xf32>
    %153 = math.tanh %152 : vector<8x32xf32>
    %cst_29 = arith.constant 1.000000e+00 : f32
    %154 = vector.broadcast %cst_29 : f32 to vector<8x32xf32>
    %155 = arith.subf %154, %147 : vector<8x32xf32>
    %156 = arith.mulf %155, %153 : vector<8x32xf32>
    %157 = arith.mulf %147, %136 : vector<8x32xf32>
    %158 = arith.addf %156, %157 : vector<8x32xf32>
    %cst_30 = arith.constant dense<0.000000e+00> : vector<8x96xf32>
    %159 = tpu.matmul %158, %25, %cst_30 {dimension_numbers = #tpu.dot_dimension_numbers<[1], [0], [0], [1], [0, 0, 1, 1], [], []>} : vector<8x32xf32>, vector<32x96xf32>, vector<8x96xf32> -> vector<8x96xf32>
    %160 = vector.extract_strided_slice %21 {offsets = [48, 0], sizes = [8, 64], strides = [1, 1]} : vector<64x64xf32> to vector<8x64xf32>
    %161 = vector.extract_strided_slice %159 {offsets = [0, 0], sizes = [8, 64], strides = [1, 1]} : vector<8x96xf32> to vector<8x64xf32>
    %162 = arith.addf %160, %161 : vector<8x64xf32>
    %163 = arith.negf %162 : vector<8x64xf32>
    %164 = math.exp %163 : vector<8x64xf32>
    %cst_31 = arith.constant 1.000000e+00 : f32
    %165 = vector.broadcast %cst_31 : f32 to vector<8x64xf32>
    %166 = arith.addf %165, %164 : vector<8x64xf32>
    %167 = arith.divf %165, %166 : vector<8x64xf32>
    %168 = vector.extract_strided_slice %167 {offsets = [0, 0], sizes = [8, 32], strides = [1, 1]} : vector<8x64xf32> to vector<8x32xf32>
    %169 = vector.extract_strided_slice %167 {offsets = [0, 32], sizes = [8, 32], strides = [1, 1]} : vector<8x64xf32> to vector<8x32xf32>
    %170 = vector.extract_strided_slice %24 {offsets = [48, 0], sizes = [8, 32], strides = [1, 1]} : vector<64x32xf32> to vector<8x32xf32>
    %171 = vector.extract_strided_slice %159 {offsets = [0, 64], sizes = [8, 32], strides = [1, 1]} : vector<8x96xf32> to vector<8x32xf32>
    %172 = arith.addf %171, %16 : vector<8x32xf32>
    %173 = arith.mulf %168, %172 : vector<8x32xf32>
    %174 = arith.addf %170, %173 : vector<8x32xf32>
    %175 = math.tanh %174 : vector<8x32xf32>
    %cst_32 = arith.constant 1.000000e+00 : f32
    %176 = vector.broadcast %cst_32 : f32 to vector<8x32xf32>
    %177 = arith.subf %176, %169 : vector<8x32xf32>
    %178 = arith.mulf %177, %175 : vector<8x32xf32>
    %179 = arith.mulf %169, %158 : vector<8x32xf32>
    %180 = arith.addf %178, %179 : vector<8x32xf32>
    %cst_33 = arith.constant dense<0.000000e+00> : vector<8x96xf32>
    %181 = tpu.matmul %180, %25, %cst_33 {dimension_numbers = #tpu.dot_dimension_numbers<[1], [0], [0], [1], [0, 0, 1, 1], [], []>} : vector<8x32xf32>, vector<32x96xf32>, vector<8x96xf32> -> vector<8x96xf32>
    %182 = vector.extract_strided_slice %21 {offsets = [56, 0], sizes = [8, 64], strides = [1, 1]} : vector<64x64xf32> to vector<8x64xf32>
    %183 = vector.extract_strided_slice %181 {offsets = [0, 0], sizes = [8, 64], strides = [1, 1]} : vector<8x96xf32> to vector<8x64xf32>
    %184 = arith.addf %182, %183 : vector<8x64xf32>
    %185 = arith.negf %184 : vector<8x64xf32>
    %186 = math.exp %185 : vector<8x64xf32>
    %cst_34 = arith.constant 1.000000e+00 : f32
    %187 = vector.broadcast %cst_34 : f32 to vector<8x64xf32>
    %188 = arith.addf %187, %186 : vector<8x64xf32>
    %189 = arith.divf %187, %188 : vector<8x64xf32>
    %190 = vector.extract_strided_slice %189 {offsets = [0, 0], sizes = [8, 32], strides = [1, 1]} : vector<8x64xf32> to vector<8x32xf32>
    %191 = vector.extract_strided_slice %189 {offsets = [0, 32], sizes = [8, 32], strides = [1, 1]} : vector<8x64xf32> to vector<8x32xf32>
    %192 = vector.extract_strided_slice %24 {offsets = [56, 0], sizes = [8, 32], strides = [1, 1]} : vector<64x32xf32> to vector<8x32xf32>
    %193 = vector.extract_strided_slice %181 {offsets = [0, 64], sizes = [8, 32], strides = [1, 1]} : vector<8x96xf32> to vector<8x32xf32>
    %194 = arith.addf %193, %16 : vector<8x32xf32>
    %195 = arith.mulf %190, %194 : vector<8x32xf32>
    %196 = arith.addf %192, %195 : vector<8x32xf32>
    %197 = math.tanh %196 : vector<8x32xf32>
    %cst_35 = arith.constant 1.000000e+00 : f32
    %198 = vector.broadcast %cst_35 : f32 to vector<8x32xf32>
    %199 = arith.subf %198, %191 : vector<8x32xf32>
    %200 = arith.mulf %199, %197 : vector<8x32xf32>
    %201 = arith.mulf %191, %180 : vector<8x32xf32>
    %202 = arith.addf %200, %201 : vector<8x32xf32>
    %203 = tpu.concatenate %48, %70, %92, %114, %136, %158, %180, %202 in 0 : vector<8x32xf32>, vector<8x32xf32>, vector<8x32xf32>, vector<8x32xf32>, vector<8x32xf32>, vector<8x32xf32>, vector<8x32xf32>, vector<8x32xf32> -> vector<64x32xf32>
    %204 = vector.shape_cast %203 : vector<64x32xf32> to vector<8x8x32xf32>
    %cst_36 = arith.constant dense<0.000000e+00> : vector<8x32xf32>
    %205 = vector.multi_reduction <add>, %204, %cst_36 [1] : vector<8x8x32xf32> to vector<8x32xf32>
    %cst_37 = arith.constant 8.000000e+00 : f32
    %206 = vector.broadcast %cst_37 : f32 to vector<8x32xf32>
    %207 = arith.divf %205, %206 : vector<8x32xf32>
    %c0_38 = arith.constant 0 : index
    %c0_39 = arith.constant 0 : index
    %208 = vector.load %arg5[%c0_38, %c0_39] : memref<32x16xf32, #tpu.memory_space<vmem>>, vector<32x16xf32>
    %cst_40 = arith.constant dense<0.000000e+00> : vector<8x16xf32>
    %209 = tpu.matmul %207, %208, %cst_40 {dimension_numbers = #tpu.dot_dimension_numbers<[1], [0], [0], [1], [0, 0, 1, 1], [], []>} : vector<8x32xf32>, vector<32x16xf32>, vector<8x16xf32> -> vector<8x16xf32>
    %c0_41 = arith.constant 0 : index
    %c0_42 = arith.constant 0 : index
    %210 = vector.load %arg6[%c0_41, %c0_42] : memref<1x16xf32, #tpu.memory_space<vmem>>, vector<1x16xf32>
    %211 = vector.broadcast %210 : vector<1x16xf32> to vector<8x16xf32>
    %212 = arith.addf %209, %211 : vector<8x16xf32>
    %c0_43 = arith.constant 0 : index
    %c0_44 = arith.constant 0 : index
    %213 = vector.load %arg7[%c0_43, %c0_44] : memref<8x16xf32, #tpu.memory_space<vmem>>, vector<8x16xf32>
    tpu.vector_store %arg7[%c0_43, %c0_44], %212 {strides = array<i32>} : memref<8x16xf32, #tpu.memory_space<vmem>>, vector<8x16xf32>,
    return
  }
}

</mosaic_0001>

<bundles_post_ra>
// kernel: tpu_custom_call.1
= control target key start
LH: loop header
LB: loop body
LE: loop exit
PB: predicated region body
PF: predicated region fallthrough
CT: control target
= control target key end

     0   :  { %v1815_v2 = vmov 0   ;;  %s2182_s0 = inlined_call_operand.vmem [shape: s32[64,1], index: 0, kind: input, shape index: {}]   ;;  %s2183_s1 = inlined_call_operand.vmem [shape: f32[64,32], index: 1, kind: input, shape index: {}]   ;;  %s2184_s2 = inlined_call_operand.vmem [shape: f32[32,96], index: 2, kind: input, shape index: {}]   ;;  %s2185_s3 = inlined_call_operand.vmem [shape: f32[32,96], index: 3, kind: input, shape index: {}]   ;;  %s2186_s4 = inlined_call_operand.vmem [shape: f32[2,96], index: 4, kind: input, shape index: {}]   ;;  %s2187_s5 = inlined_call_operand.vmem [shape: f32[32,16], index: 5, kind: input, shape index: {}]   ;;  %s2188_s6 = inlined_call_operand.vmem [shape: f32[1,16], index: 6, kind: input, shape index: {}]   ;;  %s2189_s7 = inlined_call_operand.hbm [shape: f32[8,16], index: 7, kind: output, shape index: {}]  }
   0x1   :  { %v29_v0 = vld [vmem:[%s2182_s0 + $0x10] sm:$0xff]  ;;  %v27_v1 = vld [vmem:[%s2182_s0] sm:$0xff]  ;;  %1742 = vset.pattern.permute.xlu1 %v1815_v2  ;;  %1741 = vset.pattern.permute.xlu0 %v1815_v2  ;;  %v30_v3 = vld [vmem:[%s2182_s0 + $0x18] sm:$0xff] }
   0x2   :  { %44 = vperm.xlu1 %1742, %v29_v0   ;;  %38 = vperm.xlu0 %1741, %v27_v1   ;;  %v28_v4 = vld [vmem:[%s2182_s0 + $0x8] sm:$0xff]  ;;  %v85_v5 = vld [vmem:[%s2183_s1] sm:$0xff]  ;;  %v87_v7 = vld [vmem:[%s2183_s1 + $0x10] sm:$0xff] }
   0x3   :  { %v86_v6 = vld [vmem:[%s2183_s1 + $0x8] sm:$0xff]  ;;  %v88_v8 = vld [vmem:[%s2183_s1 + $0x18] sm:$0xff] }
   0x4   :  { %v1656_v9 = vpack.c.bf16 %v86_v6, %v85_v5  ;;  %v1660_v10 = vpack.c.bf16 %v88_v8, %v87_v7 }
   0x5   :  { %12 = vsyncpa [#allocation3], 0  ;;  %v89_v11 = vld [vmem:[%s2183_s1 + $0x20] sm:$0xff]  ;;  %v90_v12 = vld [vmem:[%s2183_s1 + $0x28] sm:$0xff]  ;;  %v35_v27 = vlaneseq  ;;  %vm93_vm0 = vcmask 523264   ;;  %v1816_v31 = vmov 0.0  }
   0x6   :  { %47 = vperm.xlu1 %1742, %v30_v3   ;;  %41 = vperm.xlu0 %1741, %v28_v4   ;;  %v32_v13 = vld [vmem:[%s2182_s0 + $0x28] sm:$0xff]  ;;  %v31_v14 = vld [vmem:[%s2182_s0 + $0x20] sm:$0xff]  ;;  %v1664_v15 = vpack.c.bf16 %v90_v12, %v89_v11  ;;  %v91_v16 = vld [vmem:[%s2183_s1 + $0x30] sm:$0xff]  ;;  %v1817_v46 = vmov 0.0|0.0   ;;  %vm1818_vm9 = vmmov 0   ;;  %vm234_vm10 = vcmask 261120  }
   0x7   :  { %1657 = vmatprep.subr.bf16.mxu0 %v1656_v9  ;;  %v92_v17 = vld [vmem:[%s2183_s1 + $0x38] sm:$0xff]  ;;  %v33_v19 = vld [vmem:[%s2182_s0 + $0x30] sm:$0xff]  ;;  %v230_v21 = vld [vmem:[%s2184_s2] sm:$0xff]  ;;  %v36_v28 = vand.u32 127, %v35_v27  ;;  %v227_v61 = vshrl.u32 %v35_v27, 7  ;;  %s1820_s26 = smov 96  }
   0x8   :  { %1659 = vmatpush3.bf16.msra.mxu0 %v1656_v9  ;;  %v34_v18 = vld [vmem:[%s2182_s0 + $0x38] sm:$0xff]  ;;  %v1668_v20 = vpack.c.bf16 %v92_v17, %v91_v16  ;;  %v231_v22 = vld [vmem:[%s2184_s2 + $0x8] sm:$0xff]  ;;  %v232_v23 = vld [vmem:[%s2184_s2 + $0x10] sm:$0xff]  ;;  %vm1206_vm11 = vcmask 523520   ;;  %vm1291_vm12 = vcmask 1041409   ;;  %vm1293_vm13 = vcmask 1042434  }
   0x9   :  { %1661 = vmatprep.subr.bf16.mxu0 %v1660_v10  ;;  %v1672_v24 = vpack.c.bf16 %v231_v22, %v230_v21  ;;  %v233_v25 = vld [vmem:[%s2184_s2 + $0x18] sm:$0xff]  ;;  %v388_v47 = vld [vmem:[%s2185_s3] sm:$0xff]  ;;  %v389_v48 = vld [vmem:[%s2185_s3 + $0x8] sm:$0xff]  ;;  %v228_v0 = vsub.s32 0, %v227_v61  ;;  %vm1295_vm14 = vcmask 1043459   ;;  %vm1297_vm15 = vcmask 1044484  }
   0xa   :  { %53 = vperm.xlu1 %1742, %v32_v13   ;;  %50 = vperm.xlu0 %1741, %v31_v14   ;;  %v1676_v26 = vpack.c.bf16 %v233_v25, %v232_v23  ;;  %v1947_v49 = vpack.c.bf16 %v389_v48, %v388_v47  ;;  %v390_v50 = vld [vmem:[%s2185_s3 + $0x10] sm:$0xff]  ;;  %v391_v51 = vld [vmem:[%s2185_s3 + $0x18] sm:$0xff]  ;;  %v223_v62 = vld [vmem:[%s2186_s4] sm:$0x1]  ;;  %s1821_s12 = smov [#allocation2]  }
   0xb   :  { %1673 = vmatprep.subr.bf16.mxu1 %v1672_v24  ;;  %v1957_v52 = vpack.c.bf16 %v391_v51, %v390_v50  ;;  %v224_v63 = vld [vmem:[%s2186_s4 + $0x1] sm:$0x1]  ;;  %v379_v3 = vrot.slane %v223_v62, %v228_v0  ;;  %s1819_s4 = smov 64   ;;  %s1387_s13 = sshll.u32 %s1821_s12, 4  ;;  %s1388_s13 = int_to_ptr.vmem [resolvable:$true] %s1387_s13 }
   0xc   :  { %1663 = vmatpush3.bf16.msra.mxu0 %v1660_v10  ;;  %1675 = vmatpush3.bf16.msra.mxu1 %v1672_v24  ;;  %v225_v1 = vadd.f32 %v224_v63, %v223_v62  ;;  %s1791_s14 = scalar_lea.vmem %s1388_s13, 128  ;;  %p1796_p1 = scmp.lt.s32.totalorder %s1388_s13, %s1388_s13 }
   0xd   :  { %1665 = vmatprep.subr.bf16.mxu0 %v1664_v15  ;;  %1677 = vmatprep.subr.bf16.mxu1 %v1676_v26  ;;  %p1792_p0 = scmp.ne.s32.totalorder %s1388_s13, %s1791_s14  ;;  %p1797_p2 = scmp.lt.s32.totalorder %s1791_s14, %s1791_s14 }
   0xe   :  { %59 = vperm.xlu1 %1742, %v34_v18   ;;  %56 = vperm.xlu0 %1741, %v33_v19   ;;  %v367_v2 = vrot.slane %v225_v1, %v228_v0 }
   0xf   :  { %p1798_p3 = por %p1797_p2, %p1796_p1 }
  0x10   :  { %1667 = vmatpush3.bf16.msra.mxu0 %v1664_v15  ;;  %1679 = vmatpush3.bf16.msra.mxu1 %v1676_v26  ;;  %v2013_v26 = vrot.slane %v224_v63, %v228_v0 }
  0x11   :  { %1669 = vmatprep.subr.bf16.mxu0 %v1668_v20  ;;  %1680 = vmatprep.subr.bf16.mxu1 %v1817_v46  ;;  %p1799_p4 = pnand %p1798_p3, %p1792_p0 }
  0x14   :  { %1671 = vmatpush3.bf16.msra.mxu0 %v1668_v20 }
  0x15   :  { %1686 = vmatprep.subr.bf16.mxu0 %v1817_v46 }
  0x81   :  { %v45_v29 = vpop.permute.xlu1 %44  ;;  %v39_v30 = vpop.permute.xlu0 %38 }
  0x82   :  { %vm61_vm1 = vcmp.eq.s32.totalorder %v36_v28, %v39_v30  ;;  %vm63_vm2 = vcmp.eq.s32.totalorder %v36_v28, %v45_v29 }
  0x83   :  { %v1395_v32 = vsel %vm61_vm1, 1.0, %v1816_v31  ;;  %v1397_v35 = vsel %vm63_vm2, 1.0, %v1816_v31  ;;  %vm1301_vm1 = vcmask 1046534   ;;  %vm1303_vm2 = vcmask 1047559  }
  0x84   :  { %1525 = vmatprep.mubr.msk.f32.mxu0 %vm93_vm0, %v1395_v32 }
  0x85   :  { %v48_v33 = vpop.permute.xlu1 %47  ;;  %v42_v34 = vpop.permute.xlu0 %41 }
  0x86   :  { %vm62_vm3 = vcmp.eq.s32.totalorder %v36_v28, %v42_v34  ;;  %vm64_vm4 = vcmp.eq.s32.totalorder %v36_v28, %v48_v33 }
  0x87   :  { %v1396_v36 = vsel %vm62_vm3, 1.0, %v1816_v31  ;;  %v1398_v39 = vsel %vm64_vm4, 1.0, %v1816_v31  ;;  %vm1379_vm3 = vcmask 130048  }
  0x88   :  { %1526 = vmatmul.mubr.msk.f32.vlgmr.msra.gmra.mrb[0].mxu0 %vm93_vm0, %v1396_v36 }
  0x89   :  { %v54_v37 = vpop.permute.xlu1 %53  ;;  %1528 = vmatprep.mubr.msk.f32.mxu0 %vm93_vm0, %v1397_v35  ;;  %v51_v38 = vpop.permute.xlu0 %50  ;;  %1688 = vmatpush3.bf16.msra.mxu0 %v1947_v49 }
  0x8a   :  { %vm65_vm5 = vcmp.eq.s32.totalorder %v36_v28, %v51_v38  ;;  %vm66_vm6 = vcmp.eq.s32.totalorder %v36_v28, %v54_v37  ;;  %1689 = vmatprep.subr.bf16.mxu0 %v1817_v46 }
  0x8b   :  { %v1399_v40 = vsel %vm65_vm5, 1.0, %v1816_v31  ;;  %v1400_v43 = vsel %vm66_vm6, 1.0, %v1816_v31 }
  0x8c   :  { %1529 = vmatmul.mubr.msk.f32.gmra.mrb[2].mxu0 %vm93_vm0, %v1398_v39 }
  0x8d   :  { %v60_v41 = vpop.permute.xlu1 %59  ;;  %1531 = vmatprep.mubr.msk.f32.mxu0 %vm93_vm0, %v1399_v40  ;;  %v57_v42 = vpop.permute.xlu0 %56  ;;  %1691 = vmatpush3.bf16.msra.mxu0 %v1957_v52 }
  0x8e   :  { %vm67_vm7 = vcmp.eq.s32.totalorder %v36_v28, %v57_v42  ;;  %vm68_vm8 = vcmp.eq.s32.totalorder %v36_v28, %v60_v41  ;;  %1698 = vmatprep.subr.bf16.mxu0 %v1817_v46 }
  0x8f   :  { %v1401_v44 = vsel %vm67_vm7, 1.0, %v1816_v31  ;;  %v1402_v45 = vsel %vm68_vm8, 1.0, %v1816_v31 }
  0x90   :  { %1532 = vmatmul.mubr.msk.f32.gmra.mrb[4].mxu0 %vm93_vm0, %v1400_v43 }
  0x91   :  { %1534 = vmatprep.mubr.msk.f32.mxu0 %vm93_vm0, %v1401_v44 }
  0x94   :  { %1535 = vmatmul.mubr.msk.f32.gmra.mrb[6].mxu0 %vm93_vm0, %v1402_v45  ;;  %vm1299_vm0 = vcmask 1045509  }
  0x95   :  { %1576 = vmatprep.mubr.msk.f32.mxu0 %vm1818_vm9, %v1816_v31 }
 0x15b   :  { %v1527_v53 = vpop.f32.mrb[0].mxu0 }
 0x15c   :  { %v184_v54 = vpop.f32.mrb[1].mxu0 }
 0x15d   :  { %1545 = vmatprep.mubr.msk.f32.mxu1 %vm234_vm10, %v184_v54 }
 0x15e   :  { %1546 = vmatmul.mubr.msk.f32.vlgmr.msra.gmra.mrb[0].mxu1 %vm234_vm10, %v1527_v53 }
 0x15f   :  { %1682 = vmatpush3.bf16.msra.mxu1 %v1947_v49  ;;  %v1530_v55 = vpop.f32.mrb[2].mxu0 }
 0x160   :  { %v194_v56 = vpop.f32.mrb[3].mxu0  ;;  %1683 = vmatprep.subr.bf16.mxu1 %v1817_v46 }
 0x161   :  { %1548 = vmatprep.mubr.msk.f32.mxu1 %vm234_vm10, %v194_v56 }
 0x162   :  { %1549 = vmatmul.mubr.msk.f32.gmra.mrb[2].mxu1 %vm234_vm10, %v1530_v55 }
 0x163   :  { %v1533_v57 = vpop.f32.mrb[4].mxu0  ;;  %1685 = vmatpush3.bf16.msra.mxu1 %v1957_v52 }
 0x164   :  { %v204_v58 = vpop.f32.mrb[5].mxu0  ;;  %1692 = vmatprep.subr.bf16.mxu1 %v1817_v46 }
 0x165   :  { %1551 = vmatprep.mubr.msk.f32.mxu1 %vm234_vm10, %v204_v58 }
 0x166   :  { %1552 = vmatmul.mubr.msk.f32.gmra.mrb[4].mxu1 %vm234_vm10, %v1533_v57 }
 0x167   :  { %v1536_v59 = vpop.f32.mrb[6].mxu0 }
 0x168   :  { %v214_v60 = vpop.f32.mrb[7].mxu0 }
 0x169   :  { %1554 = vmatprep.mubr.msk.f32.mxu1 %vm234_vm10, %v214_v60 }
 0x16a   :  { %1555 = vmatmul.mubr.msk.f32.gmra.mrb[6].mxu1 %vm234_vm10, %v1536_v59 }
 0x16b   :  { %1565 = vmatprep.mubr.msk.f32.mxu1 %vm1818_vm9, %v1816_v31 }
 0x16e   :  { %1566 = vmatmul.mubr.f32.vlgmr.msra.gmra.mrb[8].mxu1 %v1816_v31 }
 0x16f   :  { %1694 = vmatpush3.bf16.msra.mxu1 %v1947_v49  ;;  %1587 = vmatprep.mubr.msk.f32.mxu1 %vm1818_vm9, %v1816_v31 }
 0x170   :  { %1695 = vmatprep.subr.bf16.mxu1 %v1817_v46 }
 0x173   :  { %1697 = vmatpush3.bf16.msra.mxu1 %v1957_v52 }
 0x174   :  { %1704 = vmatprep.subr.bf16.mxu1 %v1817_v46 }
 0x231   :  { %v1547_v4 = vpop.f32.mrb[0].mxu1 }
 0x232   :  { %v369_v5 = vadd.f32 %v1547_v4, %v367_v2  ;;  %v1991_v6 = vadd.f32 %v1547_v4, %v379_v3  ;;  %v325_v7 = vpop.f32.mrb[1].mxu1 }
 0x233   :  { %v368_v8 = vadd.f32 %v367_v2, %v325_v7  ;;  %v380_v9 = vadd.f32 %v379_v3, %v325_v7 }
 0x235   :  { %v1550_v10 = vpop.f32.mrb[2].mxu1 }
 0x236   :  { %v1993_v11 = vadd.f32 %v1550_v10, %v367_v2  ;;  %v1995_v12 = vadd.f32 %v1550_v10, %v379_v3  ;;  %v335_v13 = vpop.f32.mrb[3].mxu1 }
 0x237   :  { %v1997_v14 = vadd.f32 %v367_v2, %v335_v13  ;;  %v1999_v15 = vadd.f32 %v379_v3, %v335_v13 }
 0x239   :  { %v1553_v16 = vpop.f32.mrb[4].mxu1 }
 0x23a   :  { %v2001_v17 = vadd.f32 %v1553_v16, %v367_v2  ;;  %v2003_v18 = vadd.f32 %v1553_v16, %v379_v3  ;;  %v345_v19 = vpop.f32.mrb[5].mxu1 }
 0x23b   :  { %v2005_v20 = vadd.f32 %v367_v2, %v345_v19  ;;  %v2007_v21 = vadd.f32 %v379_v3, %v345_v19 }
 0x23d   :  { %v1556_v22 = vpop.f32.mrb[6].mxu1 }
 0x23e   :  { %v2009_v23 = vadd.f32 %v1556_v22, %v367_v2  ;;  %v2011_v24 = vadd.f32 %v1556_v22, %v379_v3  ;;  %v355_v25 = vpop.f32.mrb[7].mxu1 }
 0x23f   :  { %v2015_v27 = vadd.f32 %v367_v2, %v355_v25  ;;  %v2017_v28 = vadd.f32 %v379_v3, %v355_v25 }
 0x241   :  { %v461_v29 = vpop.f32.mrb[8].mxu1 }
 0x242   :  { %v465_v30 = vadd.f32 %v461_v29, %v368_v8  ;;  %v472_v32 = vadd.f32 %v461_v29, %v2013_v26  ;;  %v1567_v33 = vpop.f32.mrb[9].mxu1 }
 0x244   :  { %474 = vrot.lane.b32.xlu0 %v472_v32, %s1819_s4  ;;  %v1419_v34 = vmul.f32 -1.442695, %v465_v30 }
 0x246   :  { %1743 = vpow2.f32 %v1419_v34 }
 0x250   :  { %v1744_v35 = vpop.eup %1743 }
 0x251   :  { %v469_v36 = vadd.f32 1.0, %v1744_v35 }
 0x253   :  { %1745 = vrcp.f32 %v469_v36 }
 0x25d   :  { %v1746_v37 = vpop.eup %1745 }
 0x25e   :  { %v484_v43 = vsub.f32 1.0, %v1746_v37  ;;  %v490_v45 = vmul.f32 0.0, %v1746_v37 }
 0x2b6   :  { %v475_v38 = vpop.permute.xlu0 %474 }
 0x2b7   :  { %v477_v39 = vmul.f32 %v1746_v37, %v475_v38 }
 0x2b9   :  { %479 = vrot.lane.b32.xlu1 %v477_v39, %s1819_s4 }
 0x32b   :  { %v480_v40 = vpop.permute.xlu1 %479 }
 0x32c   :  { %v482_v41 = vadd.f32 %v480_v40, %v380_v9 }
 0x32e   :  { %1747 = vtanh.f32 %v482_v41 }
 0x338   :  { %v1748_v42 = vpop.eup %1747 }
 0x339   :  { %486 = vrot.lane.b32.xlu0 %v1748_v42, %s1820_s26 }
 0x3ab   :  { %v487_v44 = vpop.permute.xlu0 %486 }
 0x3ac   :  { %v489_v47 = vmul.f32 %v487_v44, %v484_v43 }
 0x3ae   :  { %v2023_v48 = vadd.f32 %v490_v45, %v489_v47 }
 0x3b0   :  { %493 = vrot.lane.b32.xlu1 %v2023_v48, %s1820_s26 }
 0x422   :  { %v494_v50 = vpop.permute.xlu1 %493 }
 0x423   :  { %1577 = vmatmul.mubr.msk.f32.vlgmr.msra.gmra.mrb[8].mxu0 %vm234_vm10, %v494_v50 }
 0x424   :  { %1700 = vmatpush3.bf16.msra.mxu0 %v1947_v49  ;;  %1598 = vmatprep.mubr.msk.f32.mxu0 %vm1818_vm9, %v1816_v31 }
 0x425   :  { %1701 = vmatprep.subr.bf16.mxu0 %v1817_v46 }
 0x428   :  { %1703 = vmatpush3.bf16.msra.mxu0 %v1957_v52 }
 0x429   :  { %1710 = vmatprep.subr.bf16.mxu0 %v1817_v46 }
 0x4f6   :  { %v563_v51 = vpop.f32.mrb[8].mxu0 }
 0x4f7   :  { %v567_v53 = vadd.f32 %v563_v51, %v369_v5  ;;  %v574_v54 = vadd.f32 %v563_v51, %v2013_v26  ;;  %v1578_v55 = vpop.f32.mrb[9].mxu0 }
 0x4f9   :  { %576 = vrot.lane.b32.xlu0 %v574_v54, %s1819_s4  ;;  %v1421_v56 = vmul.f32 -1.442695, %v567_v53 }
 0x4fb   :  { %1749 = vpow2.f32 %v1421_v56 }
 0x505   :  { %v1750_v57 = vpop.eup %1749 }
 0x506   :  { %v571_v58 = vadd.f32 1.0, %v1750_v57 }
 0x508   :  { %1751 = vrcp.f32 %v571_v58 }
 0x512   :  { %v1752_v59 = vpop.eup %1751 }
 0x513   :  { %v586_v1 = vsub.f32 1.0, %v1752_v59  ;;  %v592_v3 = vmul.f32 %v1752_v59, %v2023_v48 }
 0x56b   :  { %v577_v60 = vpop.permute.xlu0 %576 }
 0x56c   :  { %v579_v61 = vmul.f32 %v1752_v59, %v577_v60 }
 0x56e   :  { %581 = vrot.lane.b32.xlu1 %v579_v61, %s1819_s4 }
 0x5e0   :  { %v582_v62 = vpop.permute.xlu1 %581 }
 0x5e1   :  { %v584_v63 = vadd.f32 %v582_v62, %v1991_v6 }
 0x5e3   :  { %1753 = vtanh.f32 %v584_v63 }
 0x5ed   :  { %v1754_v0 = vpop.eup %1753 }
 0x5ee   :  { %588 = vrot.lane.b32.xlu0 %v1754_v0, %s1820_s26 }
 0x660   :  { %v589_v2 = vpop.permute.xlu0 %588 }
 0x661   :  { %v591_v4 = vmul.f32 %v589_v2, %v586_v1 }
 0x663   :  { %v2040_v5 = vadd.f32 %v592_v3, %v591_v4 }
 0x665   :  { %595 = vrot.lane.b32.xlu1 %v2040_v5, %s1820_s26 }
 0x6d7   :  { %v596_v7 = vpop.permute.xlu1 %595 }
 0x6d8   :  { %1588 = vmatmul.mubr.msk.f32.vlgmr.msra.gmra.mrb[10].mxu1 %vm234_vm10, %v596_v7 }
 0x6d9   :  { %1706 = vmatpush3.bf16.msra.mxu1 %v1947_v49  ;;  %1609 = vmatprep.mubr.msk.f32.mxu1 %vm1818_vm9, %v1816_v31 }
 0x6da   :  { %1707 = vmatprep.subr.bf16.mxu1 %v1817_v46 }
 0x6dd   :  { %1709 = vmatpush3.bf16.msra.mxu1 %v1957_v52 }
 0x6de   :  { %1716 = vmatprep.subr.bf16.mxu1 %v1817_v46 }
 0x7ab   :  { %v665_v6 = vpop.f32.mrb[10].mxu1 }
 0x7ac   :  { %v669_v8 = vadd.f32 %v665_v6, %v1997_v14  ;;  %v676_v9 = vadd.f32 %v665_v6, %v2013_v26  ;;  %v1589_v10 = vpop.f32.mrb[11].mxu1 }
 0x7ae   :  { %678 = vrot.lane.b32.xlu0 %v676_v9, %s1819_s4  ;;  %v1423_v13 = vmul.f32 -1.442695, %v669_v8 }
 0x7b0   :  { %1755 = vpow2.f32 %v1423_v13 }
 0x7ba   :  { %v1756_v16 = vpop.eup %1755 }
 0x7bb   :  { %v673_v19 = vadd.f32 1.0, %v1756_v16 }
 0x7bd   :  { %1757 = vrcp.f32 %v673_v19 }
 0x7c7   :  { %v1758_v22 = vpop.eup %1757 }
 0x7c8   :  { %v688_v33 = vsub.f32 1.0, %v1758_v22  ;;  %v694_v35 = vmul.f32 %v1758_v22, %v2040_v5 }
 0x820   :  { %v679_v25 = vpop.permute.xlu0 %678 }
 0x821   :  { %v681_v29 = vmul.f32 %v1758_v22, %v679_v25 }
 0x823   :  { %683 = vrot.lane.b32.xlu1 %v681_v29, %s1819_s4 }
 0x895   :  { %v684_v30 = vpop.permute.xlu1 %683 }
 0x896   :  { %v686_v32 = vadd.f32 %v684_v30, %v1999_v15 }
 0x898   :  { %1759 = vtanh.f32 %v686_v32 }
 0x8a2   :  { %v1760_v14 = vpop.eup %1759 }
 0x8a3   :  { %690 = vrot.lane.b32.xlu0 %v1760_v14, %s1820_s26 }
 0x915   :  { %v691_v34 = vpop.permute.xlu0 %690 }
 0x916   :  { %v693_v36 = vmul.f32 %v691_v34, %v688_v33 }
 0x918   :  { %v2058_v37 = vadd.f32 %v694_v35, %v693_v36 }
 0x91a   :  { %697 = vrot.lane.b32.xlu1 %v2058_v37, %s1820_s26 }
 0x98c   :  { %v698_v38 = vpop.permute.xlu1 %697 }
 0x98d   :  { %1599 = vmatmul.mubr.msk.f32.vlgmr.msra.gmra.mrb[10].mxu0 %vm234_vm10, %v698_v38 }
 0x98e   :  { %1712 = vmatpush3.bf16.msra.mxu0 %v1947_v49  ;;  %1620 = vmatprep.mubr.msk.f32.mxu0 %vm1818_vm9, %v1816_v31 }
 0x98f   :  { %1713 = vmatprep.subr.bf16.mxu0 %v1817_v46 }
 0x992   :  { %1715 = vmatpush3.bf16.msra.mxu0 %v1957_v52 }
 0x993   :  { %1722 = vmatprep.subr.bf16.mxu0 %v1817_v46 }
 0xa60   :  { %v767_v15 = vpop.f32.mrb[10].mxu0 }
 0xa61   :  { %v771_v39 = vadd.f32 %v767_v15, %v1993_v11  ;;  %v778_v40 = vadd.f32 %v767_v15, %v2013_v26  ;;  %v1600_v41 = vpop.f32.mrb[11].mxu0 }
 0xa63   :  { %780 = vrot.lane.b32.xlu0 %v778_v40, %s1819_s4  ;;  %v1425_v42 = vmul.f32 -1.442695, %v771_v39 }
 0xa65   :  { %1761 = vpow2.f32 %v1425_v42 }
 0xa6f   :  { %v1762_v43 = vpop.eup %1761 }
 0xa70   :  { %v775_v44 = vadd.f32 1.0, %v1762_v43 }
 0xa72   :  { %1763 = vrcp.f32 %v775_v44 }
 0xa7c   :  { %v1764_v45 = vpop.eup %1763 }
 0xa7d   :  { %v790_v54 = vsub.f32 1.0, %v1764_v45  ;;  %v796_v56 = vmul.f32 %v1764_v45, %v2058_v37 }
 0xad5   :  { %v781_v47 = vpop.permute.xlu0 %780 }
 0xad6   :  { %v783_v50 = vmul.f32 %v1764_v45, %v781_v47 }
 0xad8   :  { %785 = vrot.lane.b32.xlu1 %v783_v50, %s1819_s4 }
 0xb4a   :  { %v786_v51 = vpop.permute.xlu1 %785 }
 0xb4b   :  { %v788_v53 = vadd.f32 %v786_v51, %v1995_v12 }
 0xb4d   :  { %1765 = vtanh.f32 %v788_v53 }
 0xb57   :  { %v1766_v11 = vpop.eup %1765 }
 0xb58   :  { %792 = vrot.lane.b32.xlu0 %v1766_v11, %s1820_s26 }
 0xbca   :  { %v793_v55 = vpop.permute.xlu0 %792 }
 0xbcb   :  { %v795_v57 = vmul.f32 %v793_v55, %v790_v54 }
 0xbcd   :  { %v2076_v58 = vadd.f32 %v796_v56, %v795_v57 }
 0xbcf   :  { %799 = vrot.lane.b32.xlu1 %v2076_v58, %s1820_s26 }
 0xc41   :  { %v800_v59 = vpop.permute.xlu1 %799 }
 0xc42   :  { %1610 = vmatmul.mubr.msk.f32.vlgmr.msra.gmra.mrb[12].mxu1 %vm234_vm10, %v800_v59 }
 0xc43   :  { %1718 = vmatpush3.bf16.msra.mxu1 %v1947_v49  ;;  %1631 = vmatprep.mubr.msk.f32.mxu1 %vm1818_vm9, %v1816_v31 }
 0xc44   :  { %1719 = vmatprep.subr.bf16.mxu1 %v1817_v46 }
 0xc47   :  { %1721 = vmatpush3.bf16.msra.mxu1 %v1957_v52 }
 0xc48   :  { %1728 = vmatprep.subr.bf16.mxu1 %v1817_v46 }
 0xd15   :  { %v869_v12 = vpop.f32.mrb[12].mxu1 }
 0xd16   :  { %v873_v60 = vadd.f32 %v869_v12, %v2005_v20  ;;  %v880_v61 = vadd.f32 %v869_v12, %v2013_v26  ;;  %v1611_v62 = vpop.f32.mrb[13].mxu1 }
 0xd18   :  { %882 = vrot.lane.b32.xlu0 %v880_v61, %s1819_s4  ;;  %v1427_v63 = vmul.f32 -1.442695, %v873_v60 }
 0xd1a   :  { %1767 = vpow2.f32 %v1427_v63 }
 0xd24   :  { %v1768_v0 = vpop.eup %1767 }
 0xd25   :  { %v877_v1 = vadd.f32 1.0, %v1768_v0 }
 0xd27   :  { %1769 = vrcp.f32 %v877_v1 }
 0xd31   :  { %v1770_v2 = vpop.eup %1769 }
 0xd32   :  { %v892_v8 = vsub.f32 1.0, %v1770_v2  ;;  %v898_v10 = vmul.f32 %v1770_v2, %v2076_v58 }
 0xd8a   :  { %v883_v3 = vpop.permute.xlu0 %882 }
 0xd8b   :  { %v885_v4 = vmul.f32 %v1770_v2, %v883_v3 }
 0xd8d   :  { %887 = vrot.lane.b32.xlu1 %v885_v4, %s1819_s4 }
 0xdff   :  { %v888_v7 = vpop.permute.xlu1 %887 }
 0xe00   :  { %v890_v6 = vadd.f32 %v888_v7, %v2007_v21 }
 0xe02   :  { %1771 = vtanh.f32 %v890_v6 }
 0xe0c   :  { %v1772_v20 = vpop.eup %1771 }
 0xe0d   :  { %894 = vrot.lane.b32.xlu0 %v1772_v20, %s1820_s26 }
 0xe7f   :  { %v895_v9 = vpop.permute.xlu0 %894 }
 0xe80   :  { %v897_v13 = vmul.f32 %v895_v9, %v892_v8  ;;  %v1273_v8 = vld [vmem:[%s2187_s5 + $0x8] sm:$0xff]  ;;  %v1274_v9 = vld [vmem:[%s2187_s5 + $0x10] sm:$0xff] }
 0xe82   :  { %v2094_v16 = vadd.f32 %v898_v10, %v897_v13 }
 0xe84   :  { %901 = vrot.lane.b32.xlu1 %v2094_v16, %s1820_s26 }
 0xef6   :  { %v902_v19 = vpop.permute.xlu1 %901 }
 0xef7   :  { %1621 = vmatmul.mubr.msk.f32.vlgmr.msra.gmra.mrb[12].mxu0 %vm234_vm10, %v902_v19  ;;  %v1214_v19 = vsel %vm1206_vm11, %v2040_v5, 0.0 }
 0xef8   :  { %1724 = vmatpush3.bf16.msra.mxu0 %v1947_v49  ;;  %1642 = vmatprep.mubr.msk.f32.mxu0 %vm1818_vm9, %v1816_v31 }
 0xef9   :  { %1725 = vmatprep.subr.bf16.mxu0 %v1817_v46 }
 0xefc   :  { %1727 = vmatpush3.bf16.msra.mxu0 %v1957_v52 }
 0xfca   :  { %v971_v21 = vpop.f32.mrb[12].mxu0 }
 0xfcb   :  { %v975_v22 = vadd.f32 %v971_v21, %v2001_v17  ;;  %v982_v25 = vadd.f32 %v971_v21, %v2013_v26  ;;  %v1622_v29 = vpop.f32.mrb[13].mxu0  ;;  %v1221_v21 = vsel %vm1206_vm11, %v2058_v37, 0.0 }
 0xfcc   :  { %v1215_v29 = vrot.slane %v1214_v19, 4 }
 0xfcd   :  { %984 = vrot.lane.b32.xlu0 %v982_v25, %s1819_s4  ;;  %v1429_v30 = vmul.f32 -1.442695, %v975_v22  ;;  %v1207_v22 = vsel %vm1206_vm11, %v2023_v48, 0.0  ;;  %v1228_v25 = vsel %vm1206_vm11, %v2076_v58, 0.0 }
 0xfcf   :  { %1773 = vpow2.f32 %v1429_v30  ;;  %v1235_v30 = vsel %vm1206_vm11, %v2094_v16, 0.0 }
 0xfd0   :  { %v1236_v37 = vrot.slane %v1235_v30, 4 }
 0xfd9   :  { %v1774_v32 = vpop.eup %1773 }
 0xfda   :  { %v979_v14 = vadd.f32 1.0, %v1774_v32  ;;  %v1222_v32 = vrot.slane %v1221_v21, 4 }
 0xfdc   :  { %1775 = vrcp.f32 %v979_v14  ;;  %v1208_v14 = vrot.slane %v1207_v22, 4  ;;  %v1223_v48 = vadd.f32 %v1222_v32, %v1221_v21 }
 0xfe6   :  { %v1776_v49 = vpop.eup %1775 }
 0xfe7   :  { %v994_v36 = vsub.f32 1.0, %v1776_v49  ;;  %v1000_v15 = vmul.f32 %v1776_v49, %v2094_v16  ;;  %v1224_v16 = vrot.slane %v1223_v48, 2 }
0x103f   :  { %v985_v33 = vpop.permute.xlu0 %984 }
0x1040   :  { %v987_v34 = vmul.f32 %v1776_v49, %v985_v33  ;;  %v1229_v49 = vrot.slane %v1228_v25, 4  ;;  %v1216_v33 = vadd.f32 %v1215_v29, %v1214_v19 }
0x1042   :  { %989 = vrot.lane.b32.xlu1 %v987_v34, %s1819_s4  ;;  %v1230_v58 = vadd.f32 %v1229_v49, %v1228_v25 }
0x10b4   :  { %v990_v35 = vpop.permute.xlu1 %989 }
0x10b5   :  { %v992_v52 = vadd.f32 %v990_v35, %v2003_v18 }
0x10b7   :  { %1777 = vtanh.f32 %v992_v52  ;;  %v1209_v52 = vadd.f32 %v1208_v14, %v1207_v22 }
0x10c1   :  { %v1778_v17 = vpop.eup %1777 }
0x10c2   :  { %996 = vrot.lane.b32.xlu0 %v1778_v17, %s1820_s26  ;;  %v1237_v17 = vadd.f32 %v1236_v37, %v1235_v30 }
0x1134   :  { %v997_v38 = vpop.permute.xlu0 %996 }
0x1135   :  { %v999_v39 = vmul.f32 %v997_v38, %v994_v36  ;;  %v1217_v36 = vrot.slane %v1216_v33, 2 }
0x1137   :  { %v2111_v40 = vadd.f32 %v1000_v15, %v999_v39  ;;  %v1210_v39 = vrot.slane %v1209_v52, 2 }
0x1139   :  { %1003 = vrot.lane.b32.xlu1 %v2111_v40, %s1820_s26 }
0x11ab   :  { %v1004_v41 = vpop.permute.xlu1 %1003 }
0x11ac   :  { %1632 = vmatmul.mubr.msk.f32.vlgmr.msra.gmra.mrb[14].mxu1 %vm234_vm10, %v1004_v41  ;;  %v1231_v41 = vrot.slane %v1230_v58, 2 }
0x11ad   :  { %1653 = vmatprep.mubr.msk.f32.mxu1 %vm1818_vm9, %v1816_v31 }
0x127f   :  { %v1073_v18 = vpop.f32.mrb[14].mxu1 }
0x1280   :  { %v1077_v42 = vadd.f32 %v1073_v18, %v2015_v27  ;;  %v1084_v43 = vadd.f32 %v1073_v18, %v2013_v26  ;;  %v1633_v44 = vpop.f32.mrb[15].mxu1  ;;  %v1218_v18 = vadd.f32 %v1217_v36, %v1216_v33 }
0x1282   :  { %1086 = vrot.lane.b32.xlu0 %v1084_v43, %s1819_s4  ;;  %v1431_v45 = vmul.f32 -1.442695, %v1077_v42  ;;  %v1225_v43 = vadd.f32 %v1224_v16, %v1223_v48 }
0x1284   :  { %1779 = vpow2.f32 %v1431_v45 }
0x128e   :  { %v1780_v47 = vpop.eup %1779 }
0x128f   :  { %v1081_v50 = vadd.f32 1.0, %v1780_v47  ;;  %v1211_v47 = vadd.f32 %v1210_v39, %v1209_v52 }
0x1291   :  { %1781 = vrcp.f32 %v1081_v50  ;;  %v1232_v50 = vadd.f32 %v1231_v41, %v1230_v58 }
0x129b   :  { %v1782_v51 = vpop.eup %1781 }
0x129c   :  { %v1096_v55 = vsub.f32 1.0, %v1782_v51  ;;  %v1102_v57 = vmul.f32 %v1782_v51, %v2111_v40 }
0x12f4   :  { %v1087_v53 = vpop.permute.xlu0 %1086 }
0x12f5   :  { %v1089_v11 = vmul.f32 %v1782_v51, %v1087_v53 }
0x12f7   :  { %1091 = vrot.lane.b32.xlu1 %v1089_v11, %s1819_s4 }
0x1369   :  { %v1092_v54 = vpop.permute.xlu1 %1091 }
0x136a   :  { %v1094_v31 = vadd.f32 %v1092_v54, %v2017_v28 }
0x136c   :  { %1783 = vtanh.f32 %v1094_v31  ;;  %v1219_v31 = vrot.slane %v1218_v18, 1 }
0x1376   :  { %v1784_v27 = vpop.eup %1783 }
0x1377   :  { %1098 = vrot.lane.b32.xlu0 %v1784_v27, %s1820_s26 }
0x13e9   :  { %v1099_v56 = vpop.permute.xlu0 %1098 }
0x13ea   :  { %v1101_v59 = vmul.f32 %v1099_v56, %v1096_v55  ;;  %v1226_v55 = vrot.slane %v1225_v43, 1 }
0x13ec   :  { %v2125_v12 = vadd.f32 %v1102_v57, %v1101_v59  ;;  %v1212_v59 = vrot.slane %v1211_v47, 1 }
0x13ee   :  { %1105 = vrot.lane.b32.xlu1 %v2125_v12, %s1820_s26  ;;  %v1249_v5 = vsel %vm1206_vm11, %v2125_v12, 0.0 }
0x13ef   :  { %v1250_v35 = vrot.slane %v1249_v5, 4 }
0x13f1   :  { %v1251_v15 = vadd.f32 %v1250_v35, %v1249_v5 }
0x13f3   :  { %v1252_v44 = vrot.slane %v1251_v15, 2 }
0x13f5   :  { %v1253_v56 = vadd.f32 %v1252_v44, %v1251_v15 }
0x1460   :  { %v1106_v60 = vpop.permute.xlu1 %1105 }
0x1461   :  { %1643 = vmatmul.mubr.msk.f32.vlgmr.msra.gmra.mrb[14].mxu0 %vm234_vm10, %v1106_v60  ;;  %v1233_v60 = vrot.slane %v1232_v50, 1 }
0x1534   :  { %v1175_v61 = vpop.f32.mrb[14].mxu0 }
0x1535   :  { %v1179_v28 = vadd.f32 %v1175_v61, %v2009_v23  ;;  %v1186_v62 = vadd.f32 %v1175_v61, %v2013_v26  ;;  %v1644_v63 = vpop.f32.mrb[15].mxu0  ;;  %v1272_v26 = vld [vmem:[%s2187_s5] sm:$0xff] }
0x1536   :  { %v1729_v10 = vpack.c.bf16 %v1273_v8, %v1272_v26 }
0x1537   :  { %1188 = vrot.lane.b32.xlu0 %v1186_v62, %s1819_s4  ;;  %v1433_v0 = vmul.f32 -1.442695, %v1179_v28  ;;  %v1220_v62 = vadd.f32 %v1219_v31, %v1218_v18 }
0x1538   :  { %1730 = vmatpush3.bf16.msra.mxu1 %v1729_v10 }
0x1539   :  { %1785 = vpow2.f32 %v1433_v0  ;;  %1731 = vmatprep.subr.bf16.mxu1 %v1817_v46  ;;  %v1242_v46 = vsel %vm1206_vm11, %v2111_v40, 0.0  ;;  %v1238_v40 = vrot.slane %v1237_v17, 2 }
0x153a   :  { %v1243_v34 = vrot.slane %v1242_v46, 4 }
0x153b   :  { %v1239_v53 = vadd.f32 %v1238_v40, %v1237_v17 }
0x153c   :  { %v1244_v38 = vadd.f32 %v1243_v34, %v1242_v46  ;;  %v1434_v34 = vld [vmem:[%s2188_s6] ss:$0 sm:$0xff] }
0x153d   :  { %v1240_v61 = vrot.slane %v1239_v53, 1 }
0x153e   :  { %v1245_v42 = vrot.slane %v1244_v38, 2 }
0x1540   :  { %v1246_v27 = vadd.f32 %v1245_v42, %v1244_v38 }
0x1542   :  { %v1247_v63 = vrot.slane %v1246_v27, 1 }
0x1543   :  { %v1786_v1 = vpop.eup %1785 }
0x1544   :  { %v1183_v2 = vadd.f32 1.0, %v1786_v1  ;;  %v1227_v1 = vadd.f32 %v1226_v55, %v1225_v43 }
0x1546   :  { %1787 = vrcp.f32 %v1183_v2  ;;  %v1254_v2 = vrot.slane %v1253_v56, 1  ;;  %v1266_v26 = vmul.f32 0.125, %v1227_v1 }
0x1548   :  { %v1255_v8 = vadd.f32 %v1254_v2, %v1253_v56 }
0x154a   :  { %v1270_v25 = vmul.f32 0.125, %v1255_v8 }
0x1550   :  { %v1788_v3 = vpop.eup %1787 }
0x1551   :  { %v1198_v45 = vsub.f32 1.0, %v1788_v3  ;;  %v1204_v11 = vmul.f32 %v1788_v3, %v2125_v12  ;;  %v1241_v12 = vadd.f32 %v1240_v61, %v1239_v53 }
0x15a9   :  { %v1189_v4 = vpop.permute.xlu0 %1188 }
0x15aa   :  { %v1191_v7 = vmul.f32 %v1788_v3, %v1189_v4  ;;  %v1213_v4 = vadd.f32 %v1212_v59, %v1211_v47  ;;  %v1265_v3 = vmul.f32 0.125, %v1220_v62 }
0x15ac   :  { %1193 = vrot.lane.b32.xlu1 %v1191_v7, %s1819_s4  ;;  %v1234_v7 = vadd.f32 %v1233_v60, %v1232_v50 }
0x15ae   :  { %v1267_v10 = vmul.f32 0.125, %v1234_v7 }
0x161e   :  { %v1194_v6 = vpop.permute.xlu1 %1193 }
0x161f   :  { %v1196_v20 = vadd.f32 %v1194_v6, %v2011_v24  ;;  %v1275_v24 = vld [vmem:[%s2187_s5 + $0x18] sm:$0xff] }
0x1620   :  { %v1732_v13 = vpack.c.bf16 %v1275_v24, %v1274_v9  ;;  %v1264_v9 = vmul.f32 0.125, %v1213_v4 }
0x1621   :  { %1789 = vtanh.f32 %v1196_v20 }
0x1622   :  { %1733 = vmatpush3.bf16.msra.mxu1 %v1732_v13  ;;  %v1268_v13 = vmul.f32 0.125, %v1241_v12  ;;  %v1292_v22 = vsel %vm1291_vm12, %v1265_v3, %v1264_v9 }
0x1623   :  { %v1294_v29 = vsel %vm1293_vm13, %v1266_v26, %v1292_v22 }
0x1624   :  { %v1296_v32 = vsel %vm1295_vm14, %v1267_v10, %v1294_v29 }
0x1625   :  { %v1298_v46 = vsel %vm1297_vm15, %v1268_v13, %v1296_v32 }
0x162b   :  { %v1790_v23 = vpop.eup %1789 }
0x162c   :  { %1200 = vrot.lane.b32.xlu0 %v1790_v23, %s1820_s26  ;;  %v1248_v23 = vadd.f32 %v1247_v63, %v1246_v27 }
0x162e   :  { %v1269_v21 = vmul.f32 0.125, %v1248_v23 }
0x1630   :  { %v1300_v49 = vsel %vm1299_vm0, %v1269_v21, %v1298_v46 }
0x1631   :  { %v1302_v5 = vsel %vm1301_vm1, %v1270_v25, %v1300_v49 }
0x169e   :  { %v1201_v51 = vpop.permute.xlu0 %1200 }
0x169f   :  { %v1203_v54 = vmul.f32 %v1201_v51, %v1198_v45 }
0x16a1   :  { %v1205_v57 = vadd.f32 %v1204_v11, %v1203_v54 }
0x16a3   :  { %v1256_v28 = vsel %vm1206_vm11, %v1205_v57, 0.0 }
0x16a4   :  { %v1257_v0 = vrot.slane %v1256_v28, 4 }
0x16a6   :  { %v1258_v6 = vadd.f32 %v1257_v0, %v1256_v28 }
0x16a8   :  { %v1259_v20 = vrot.slane %v1258_v6, 2 }
0x16aa   :  { %v1260_v24 = vadd.f32 %v1259_v20, %v1258_v6 }
0x16ac   :  { %v1261_v19 = vrot.slane %v1260_v24, 1 }
0x16ae   :  { %v1262_v30 = vadd.f32 %v1261_v19, %v1260_v24 }
0x16b0   :  { %v1271_v14 = vmul.f32 0.125, %v1262_v30 }
0x16b2   :  { %v1304_v37 = vsel %vm1303_vm2, %v1271_v14, %v1302_v5 }
0x16b3   :  { %1305 = vrot.lane.b32.xlu1 %v1304_v37, %s1820_s26 }
0x1725   :  { %v1306_v33 = vpop.permute.xlu1 %1305 }
0x1726   :  { %1654 = vmatmul.mubr.msk.f32.vlgmr.msra.gmra.mrb[16].mxu1 %vm234_vm10, %v1306_v33 }
0x17f9   :  { %v1375_v48 = vpop.f32.mrb[16].mxu1 }
0x17fa   :  { %v1376_v35 = vadd.f32 %v1434_v34, %v1375_v48  ;;  %v1655_v52 = vpop.f32.mrb[17].mxu1 }
0x17fc   :  { %1380 = vst.msk [vmem:[#allocation2] sm:$0xff] %vm1379_vm3, %v1376_v35 }
0x17fd   :  { %1802 = shalt.err (!%p1799_p4)
}
0x17fe   :  { %s1803_s2 = scalar_lea.hbm %s2189_s7, 128 }
0x17ff   :  { %p1804_p5 = scmp.ne.s32.totalorder %s2189_s7, %s1803_s2  ;;  %p1807_p6 = scmp.lt.u32.totalorder %s1803_s2, %s2189_s7 }
0x1801   :  { %p1809_p7 = pnand %p1807_p6, %p1804_p5 }
0x1803   :  { %1812 = shalt.err (!%p1809_p7)
}
0x1804   :  { %1390 = dma.vmem_to_hbm [thread:$0]  %s1388_s13, 128, %s2189_s7, [#allocation3]  }
0x1805   :  { %1813 = dma.done.wait [#allocation3], 128  }
0x1806   :  { %1814 = vsyncadd [#allocation3], 4294967168 }
0x1807   :  { %1394 = vsyncpa [#allocation3], 1 }

</bundles_post_ra>
